<compile_context>
chip_gen: v7x
topology: tpu7x:2x2x1
jax: 0.10.0
libtpu: 0.0.40
codegen_flags: <defaults>
</compile_context>

<pallas_src>
import jax
import jax.numpy as jnp
import numpy as np
from jax.experimental import pallas as pl
from jax.experimental.pallas import tpu as pltpu


def _cdiv(a, b):
    return -(-a // b)


def _vmem_plan():
    """Return (tile_budget_bytes, vmem_limit_bytes) per TPU generation."""
    phys = 64 * 1024 * 1024                      # conservative default (v7x-class)
    try:
        info = pltpu.get_tpu_info()
        phys = int(getattr(info, "vmem_capacity_bytes", phys)) or phys
    except Exception:
        pass
    if phys >= 128 * 1024 * 1024:                # v5e / v6e: 128 MiB physical
        return 48 * 1024 * 1024, 64 * 1024 * 1024
    # v7x-class: 64 MiB physical, 32 MiB scoped default
    return 24 * 1024 * 1024, 32 * 1024 * 1024


def _choose_tile_n(b, C, N, dtype_bytes, tile_budget, max_tile=65536):
    """Pick (tile_n, n_tiles): tile_n is a multiple of 128 whose double-buffered
    in+out footprint fits tile_budget; n_tiles*tile_n >= N with minimal waste."""
    rows = C + 3 + (C + 3)                       # enc-in + grid-in + out rows per lane
    budget_tile = tile_budget // (2 * rows * dtype_bytes)   # 2x = double buffering
    cap = max(128, (min(max_tile, budget_tile) // 128) * 128)
    n128 = _cdiv(N, 128) * 128
    if n128 <= cap:
        tile, n_tiles = n128, 1
    else:
        n_tiles = _cdiv(N, cap)
        tile = _cdiv(_cdiv(N, n_tiles), 128) * 128
    # Keep enough total steps for pipelining / v7x megacore sharding, but never
    # shrink a tile below a floor where per-step DMA stops hiding the ~0.35us
    # fixed grid-step overhead.
    min_steps, floor = 8, 16384
    if b * n_tiles < min_steps and tile > floor:
        want = min(_cdiv(min_steps, b), _cdiv(n128, floor))
        if want > n_tiles:
            n_tiles = want
            tile = _cdiv(_cdiv(N, n_tiles), 128) * 128
    return tile, n_tiles


def _reference_grid_flat(h, w, z, n_pad, dtype):
    """get_reference_grid3d flattened to [3, h*w*z], zero-padded to n_pad lanes."""
    axes = [jnp.linspace(-1.0, 1.0, d) if d > 1 else jnp.array([-1.0], jnp.float32)
            for d in (h, w, z)]
    gi, gj, gk = jnp.meshgrid(*axes, indexing="ij")
    g = jnp.stack([gi, gj, gk], axis=0).reshape(3, h * w * z).astype(dtype)
    if n_pad != h * w * z:
        g = jnp.pad(g, ((0, 0), (0, n_pad - h * w * z)))
    return g


def make_adapter_kernel(C):
    def kernel(enc_ref, grid_ref, out_ref):
        # enc_ref: (1, C, tile_n)  grid_ref: (3, tile_n)  out_ref: (1, C+3, tile_n)
        out_ref[0, :C, :] = enc_ref[0]
        out_ref[0, C:, :] = grid_ref[...]
    return kernel


def adapter_forward(enc_out, grid=None):
    """enc_out: [b, C, h, w, z] -> [b, C+3, h*w*z]. `grid` ignored (matches torch)."""
    del grid  # overwritten inside the PyTorch forward
    b, C, h, w, z = enc_out.shape
    N = h * w * z
    dtype = enc_out.dtype
    dtype_bytes = jnp.dtype(dtype).itemsize

    tile_budget, vmem_limit = _vmem_plan()
    tile_n, n_tiles = _choose_tile_n(b, C, N, dtype_bytes, tile_budget)
    n_pad = tile_n * n_tiles

    # Pure-JAX glue: flatten (a .view in torch), pad lane axis to the tiled extent.
    x = enc_out.reshape(b, C, N)
    if n_pad != N:
        x = jnp.pad(x, ((0, 0), (0, 0), (0, n_pad - N)))
    ref_grid = _reference_grid_flat(h, w, z, n_pad, dtype)   # [3, n_pad], batch-constant

    out = pl.pallas_call(
        make_adapter_kernel(C),
        out_shape=jax.ShapeDtypeStruct((b, C + 3, n_pad), dtype),
        # n outermost / b innermost: the grid tile index is constant across the
        # inner batch steps, so Pallas does not re-DMA it.
        grid=(n_tiles, b),
        in_specs=[
            pl.BlockSpec((1, C, tile_n), lambda ni, bi: (bi, 0, ni)),
            pl.BlockSpec((3, tile_n), lambda ni, bi: (0, ni)),
        ],
        out_specs=pl.BlockSpec((1, C + 3, tile_n), lambda ni, bi: (bi, 0, ni)),
        compiler_params=pltpu.CompilerParams(
            dimension_semantics=("parallel", "parallel"),
            vmem_limit_bytes=vmem_limit,
        ),
    )(x, ref_grid)

    if n_pad != N:
        out = out[:, :, :N]
    return out


def adapter_reference(enc_out):
    """Plain-JAX reference mirroring the PyTorch forward."""
    b, C, h, w, z = enc_out.shape
    N = h * w * z
    axes = [jnp.linspace(-1.0, 1.0, d) if d > 1 else jnp.array([-1.0])
            for d in (h, w, z)]
    gi, gj, gk = jnp.meshgrid(*axes, indexing="ij")
    grid = jnp.stack([gi, gj, gk], axis=0).astype(enc_out.dtype)   # [3, h, w, z]
    grid = jnp.broadcast_to(grid[None], (b, 3, h, w, z)).reshape(b, 3, N)
    enc = enc_out.reshape(b, C, N)
    return jnp.concatenate([enc, grid], axis=1)


def _check(b, C, h, w, z, key):
    k_enc, k_grid = jax.random.split(key)
    enc_out = jax.random.normal(k_enc, (b, C, h, w, z), dtype=jnp.float32)
    grid_in = jax.random.normal(k_grid, (b, 3, h, w, z), dtype=jnp.float32)
    out = adapter_forward(enc_out, grid_in)
    out = jax.block_until_ready(out)
    ref = adapter_reference(enc_out)
    np.testing.assert_allclose(np.asarray(out), np.asarray(ref),
                               rtol=1e-6, atol=1e-6)
    assert out.shape == (b, C + 3, h * w * z)


if __name__ == "__main__":
    key = jax.random.PRNGKey(0)
    k0, k1, k2 = jax.random.split(key, 3)

    # main demo: N = 16^3 = 4096, one full-lane tile per batch element
    _check(b=2, C=4, h=16, w=16, z=16, key=k0)

    # tiny 128-unaligned case: N = 64 -> padded to 128 and sliced back
    _check(b=2, C=4, h=4, w=4, z=4, key=k1)

    # odd spatial dims: N = 5*6*7 = 210 -> padded to 256 and sliced back
    _check(b=2, C=4, h=5, w=6, z=7, key=k2)

    print("KERNEL_OK")
</pallas_src>

<mosaic_0001>
module attributes {stable_mosaic.version = 11 : i64} {
  func.func @kernel(%arg0: i32, %arg1: i32, %arg2: memref<1x4x4096xf32, #tpu.memory_space<vmem>>, %arg3: memref<3x4096xf32, #tpu.memory_space<vmem>>, %arg4: memref<1x7x4096xf32, #tpu.memory_space<vmem>>) attributes {dimension_semantics = [#tpu.dimension_semantics<parallel>, #tpu.dimension_semantics<parallel>], iteration_bounds = array<i64: 1, 2>, scalar_prefetch = 0 : i64, scratch_operands = 0 : i64, tpu.core_type = #tpu.core_type<tc>, window_params = [{transform_indices = @transform_0, window_bounds = array<i64: 1, 4, 4096>}, {transform_indices = @transform_1, window_bounds = array<i64: 3, 4096>}, {transform_indices = @transform_2, window_bounds = array<i64: 1, 7, 4096>}]} {
    %c0 = arith.constant 0 : index
    %c0_0 = arith.constant 0 : index
    %c0_1 = arith.constant 0 : index
    %0 = vector.load %arg2[%c0, %c0_0, %c0_1] : memref<1x4x4096xf32, #tpu.memory_space<vmem>>, vector<1x4x4096xf32>
    %1 = vector.shape_cast %0 : vector<1x4x4096xf32> to vector<4x4096xf32>
    %c0_2 = arith.constant 0 : index
    %c0_3 = arith.constant 0 : index
    %c0_4 = arith.constant 0 : index
    %2 = vector.load %arg4[%c0_2, %c0_3, %c0_4] : memref<1x7x4096xf32, #tpu.memory_space<vmem>>, vector<1x4x4096xf32>
    %3 = vector.shape_cast %2 : vector<1x4x4096xf32> to vector<4x4096xf32>
    %4 = vector.shape_cast %1 : vector<4x4096xf32> to vector<1x4x4096xf32>
    tpu.vector_store %arg4[%c0_2, %c0_3, %c0_4], %4 {strides = array<i32>} : memref<1x7x4096xf32, #tpu.memory_space<vmem>>, vector<1x4x4096xf32>,
    %c0_5 = arith.constant 0 : index
    %c0_6 = arith.constant 0 : index
    %5 = vector.load %arg3[%c0_5, %c0_6] : memref<3x4096xf32, #tpu.memory_space<vmem>>, vector<3x4096xf32>
    %c0_7 = arith.constant 0 : index
    %c4 = arith.constant 4 : index
    %c0_8 = arith.constant 0 : index
    %6 = vector.load %arg4[%c0_7, %c4, %c0_8] : memref<1x7x4096xf32, #tpu.memory_space<vmem>>, vector<1x3x4096xf32>
    %7 = vector.shape_cast %6 : vector<1x3x4096xf32> to vector<3x4096xf32>
    %8 = vector.shape_cast %5 : vector<3x4096xf32> to vector<1x3x4096xf32>
    tpu.vector_store %arg4[%c0_7, %c4, %c0_8], %8 {strides = array<i32>} : memref<1x7x4096xf32, #tpu.memory_space<vmem>>, vector<1x3x4096xf32>,
    return
  }
  func.func @transform_0(%arg0: i32, %arg1: i32) -> (i32, i32, i32) {
    %c0_i32 = arith.constant 0 : i32
    %c0_i32_0 = arith.constant 0 : i32
    return %arg1, %c0_i32, %arg0 : i32, i32, i32
  }
  func.func @transform_1(%arg0: i32, %arg1: i32) -> (i32, i32) {
    %c0_i32 = arith.constant 0 : i32
    %c0_i32_0 = arith.constant 0 : i32
    return %c0_i32, %arg0 : i32, i32
  }
  func.func @transform_2(%arg0: i32, %arg1: i32) -> (i32, i32, i32) {
    %c0_i32 = arith.constant 0 : i32
    %c0_i32_0 = arith.constant 0 : i32
    return %arg1, %c0_i32, %arg0 : i32, i32, i32
  }
}

</mosaic_0001>

<bundles_post_ra>
// kernel: tpu_custom_call.1
= control target key start
LH: loop header
LB: loop body
LE: loop exit
PB: predicated region body
PF: predicated region fallthrough
CT: control target
= control target key end

     0   :  { %7 = vsyncpa [#allocation3], 0  ;;  %s1004_s0 = inlined_call_operand.hbm [shape: f32[2,4,4096], index: 0, kind: input, shape index: {}]   ;;  %s1005_s1 = inlined_call_operand.hbm [shape: f32[3,4096], index: 1, kind: input, shape index: {}]   ;;  %s1006_s2 = inlined_call_operand.vmem [shape: f32[2,7,4096], index: 2, kind: output, shape index: {}]  }
   0x1   :  { %9 = vsyncpa [#allocation3 + $0x1], 0 }
   0x2   :  { %10 = vsyncpa [#allocation5], 0  ;;  %s757_s9 = smov 0   ;;  %s759_s10 = smov 0  }
   0x3   :  { %s761_s11 = smov 0   ;;  %s763_s12 = smov 0  }
   0x4   :  { %s765_s13 = smov 0   ;;  %s767_s14 = smov 0  }
   0x5 LB: > { %s511_s15 = sadd.s32 4294967295, %s738_s14   ;;  %p50_p0 = scmp.ne.s32.totalorder %s722_s10, %s718_s9  ;;  %s738_s14 = sphi %s767_s14, %s16_s14   ;;  %s734_s13 = sphi %s765_s13, %s1025_s13   ;;  %s730_s12 = sphi %s763_s12, %s1024_s12   ;;  %s726_s11 = sphi %s761_s11, %s1023_s11   ;;  %s722_s10 = sphi %s759_s10, %s1022_s10   ;;  %s718_s9 = sphi %s757_s9, %s1021_s9  }
   0x6   : > { %p787_p1 = scmp.eq.s32.totalorder %s511_s15, 0  ;;  %p513_p2 = scmp.ge.s32.totalorder %s738_s14, 1 }
   0x7   : > { %p115_p3 = scmp.lt.s32.totalorder %s738_s14, 3  ;;  %s740_s19 = smov [#allocation4]  }
   0x8   : > { %s1011_s16 = scalar_select %p787_p1, 1, 0 }
   0x9   : > { %p795_p4 = por %p787_p1, %p50_p0  ;;  %p799_p5 = pnand %p513_p2, %p115_p3 }
   0xa   : > { %s131_s20 = sshll.u32 %s740_s19, 4  ;;  %s25_s22 = sadd.s32 1, %s734_s13  ;;  %s132_s20 = int_to_ptr.vmem [resolvable:$true] %s131_s20 }
   0xb   : > { %s1012_s17 = scalar_select %p795_p4, 1, 0 }
   0xc   : > { %s1013_s18 = scalar_select %p799_p5, 1, 0 }
   0xd   : > { %p534_p6 = pneg %p799_p5  ;;  %s37_s23 = sadd.s32 1, %s726_s11 }
   0xe   : > { %p813_p8 = scmp.ge.s32.totalorder %s25_s22, 2  ;;  %s626_s27 = scalar_lea.hbm %s1005_s1, 2048 }
   0xf   : > { %p807_p7 = pnand %p534_p6, %p787_p1  ;;  %p627_p9 = scmp.ne.s32.totalorder %s1005_s1, %s626_s27 }
  0x10   : > { %s1015_s24 = scalar_select %p813_p8, 1, 0 }
  0x11   : > { %p628_p10 = pneg %p807_p7  ;;  %p633_p13 = scmp.lt.u32.totalorder %s626_s27, %s1005_s1 }
  0x13   : > { %p629_p11 = pnand %p628_p10, %p627_p9 }
  0x15   : > { %p630_p12 = pneg %p629_p11 }
  0x17   : > { %p635_p0 = pnand %p633_p13, %p630_p12 }
  0x19   : > { %638 = shalt.err (!%p635_p0)
}
  0x1a   : > { %s639_s4 = scalar_lea.vmem %s132_s20, 2048  ;;  %p647_p1 = scmp.lt.s32.totalorder %s132_s20, %s132_s20 }
  0x1b   : > { %p640_p2 = scmp.ne.s32.totalorder %s132_s20, %s639_s4  ;;  %p648_p4 = scmp.lt.s32.totalorder %s639_s4, %s639_s4 }
  0x1d   : > { %p642_p3 = pnand %p640_p2, %p628_p10  ;;  %p649_p5 = por %p648_p4, %p647_p1 }
  0x1f   : > { %p643_p6 = pneg %p642_p3 }
  0x21   : > { %p650_p8 = pnand %p649_p5, %p643_p6 }
  0x23   : > { %653 = shalt.err (!%p650_p8)
}
  0x24   : > { %537 = dma.hbm_to_vmem [thread:$0]  (!%p807_p7), %s1005_s1, 2048, %s132_s20, [#allocation5]  }
  0x25   : > { %p1016_p9 = scmp.ne.s32.totalorder %s1015_s24, 0  ;;  %p44_p1 = scmp.ne.s32.totalorder %s726_s11, %s722_s10 }
  0x26   : > { %p45_p4 = scmp.eq.s32.totalorder %s738_s14, 0  ;;  %p543_p5 = scmp.lt.s32.totalorder %s738_s14, 2 }
  0x27   : > { %s1027_s22 = smov (%p1016_p9, %s25_s22), 0  ;;  %s142_s8 = sand.u32 1, %s726_s11  }
  0x28   : > { %s32_s7 = ssub.s32 %s734_s13, %s1027_s22  ;;  %p46_p10 = por %p45_p4, %p44_p1 }
  0x29   : > { %p35_p8 = scmp.eq.s32.totalorder %s32_s7, 0  ;;  %s526_s9 = sshll.u32 %s734_s13, 11 }
  0x2a   : > { %s516_s19 = sshll.u32 %s142_s8, 7  ;;  %s853_s20 = scalar_lea.hbm %s1004_s0, %s526_s9 }
  0x2b   : > { %s848_s15 = scalar_select %p35_p8, %s726_s11, %s37_s23  }
  0x2c   : > { %s146_s24 = scalar_lea.vmem [#allocation2], %s516_s19  ;;  %p855_p7 = pnand %p543_p5, %p46_p10 }
  0x2d   : > { %s156_s26 = sshll.u32 %s146_s24, 4  ;;  %s143_s23 = scalar_lea.sflag [#allocation3], %s142_s8  ;;  %s859_s26 = int_to_ptr.vmem [resolvable:$true] %s156_s26 }
  0x2e   : > { %s654_s28 = scalar_lea.hbm %s853_s20, 2048  ;;  %p656_p12 = pneg %p855_p7 }
  0x2f   : > { %p655_p11 = scmp.ne.s32.totalorder %s853_s20, %s654_s28  ;;  %s659_s3 = scalar_lea.hbm %s1004_s0, 4096 }
  0x30   : > { %p660_p2 = scmp.lt.u32.totalorder %s853_s20, %s1004_s0  ;;  %p661_p3 = scmp.lt.u32.totalorder %s659_s3, %s654_s28 }
  0x31   : > { %p657_p13 = pnand %p656_p12, %p655_p11  ;;  %p663_p9 = scmp.lt.u32.totalorder %s654_s28, %s853_s20 }
  0x32   : > { %p662_p6 = por %p661_p3, %p660_p2 }
  0x33   : > { %p658_p0 = pneg %p657_p13 }
  0x34   : > { %p664_p1 = por %p663_p9, %p662_p6 }
  0x36   : > { %p665_p4 = pnand %p664_p1, %p658_p0 }
  0x38   : > { %668 = shalt.err (!%p665_p4)
}
  0x39   : > { %s669_s6 = scalar_lea.vmem %s859_s26, 2048  ;;  %s741_s7 = smov [#allocation2]  }
  0x3a   : > { %p670_p5 = scmp.ne.s32.totalorder %s859_s26, %s669_s6  ;;  %s674_s8 = sshll.u32 %s741_s7, 4  ;;  %s675_s8 = int_to_ptr.vmem [resolvable:$false] %s674_s8 }
  0x3b   : > { %s676_s9 = scalar_lea.vmem %s675_s8, 4096  ;;  %p677_p11 = scmp.lt.s32.totalorder %s859_s26, %s675_s8 }
  0x3c   : > { %p672_p8 = pnand %p670_p5, %p656_p12  ;;  %p678_p13 = scmp.lt.s32.totalorder %s676_s9, %s669_s6 }
  0x3e   : > { %p673_p10 = pneg %p672_p8  ;;  %p679_p2 = por %p678_p13, %p677_p11 }
  0x40   : > { %p680_p3 = pnand %p679_p2, %p673_p10 }
  0x42   : > { %683 = shalt.err (!%p680_p3)
}
  0x43   : > { %541 = dma.hbm_to_vmem [thread:$0]  (!%p855_p7), %s853_s20, 2048, %s859_s26, %s143_s23  }
  0x44   : > { %p1018_p0 = scmp.ne.s32.totalorder %s1013_s18, 0 }
  0x45   : > { %s167_s19 = sand.u32 (!%p1018_p0), 1, %s722_s10   ;;  %p1019_p12 = scmp.ne.s32.totalorder (!%p1018_p0), %s1012_s17, 0 }
  0x46   : > { %165 = sbr.rel (%p1018_p0) target bundleno = 118 (0x76), region = 28  ;;  %s520_s21 = sshll.u32 (!%p1018_p0), %s167_s19, 7 }
  0x47   : > { %s168_s25 = scalar_lea.sflag (!%p1018_p0), [#allocation3], %s167_s19  ;;  %s889_s24 = scalar_lea.vmem (!%p1018_p0), [#allocation2], %s520_s21 }
  0x4d   : > { %709 = dma.done.wait (%p1019_p12), %s168_s25, 2048  }
  0x4e   : > { %711 = vsyncadd (%p1019_p12), %s168_s25, 4294965248  ;;  %p1020_p6 = scmp.ne.s32.totalorder %s1011_s16, 0 }
  0x50   : > { %713 = dma.done.wait (%p1020_p6), [#allocation5], 2048  }
  0x51   : > { %715 = vsyncadd (%p1020_p6), [#allocation5], 4294965248  ;;  %p203_p7 = scmp.lt.s32.totalorder %s730_s12, 1  ;;  %v212_v0 = vld [vmem:[%s889_s24] sm:$0xff]  ;;  %v213_v1 = vld [vmem:[%s889_s24 + $0x8] sm:$0xff] }
  0x52   : > { %v214_v2 = vld [vmem:[%s889_s24 + $0x10] sm:$0xff]  ;;  %v244_v3 = vcombine.high %v212_v0, %v212_v0  ;;  %v245_v4 = vcombine.high %v213_v1, %v213_v1  ;;  %v215_v6 = vld [vmem:[%s889_s24 + $0x18] sm:$0xff]  ;;  %v216_v7 = vld [vmem:[%s889_s24 + $0x20] sm:$0xff] }
  0x53   : > { %s1029_s12 = smov (!%p203_p7, %s730_s12), 1  ;;  %v246_v5 = vcombine.high %v214_v2, %v214_v2  ;;  %v217_v8 = vld [vmem:[%s889_s24 + $0x28] sm:$0xff]  ;;  %v247_v9 = vcombine.high %v215_v6, %v215_v6  ;;  %v248_v10 = vcombine.high %v216_v7, %v216_v7  ;;  %v218_v12 = vld [vmem:[%s889_s24 + $0x30] sm:$0xff]  ;;  %v219_v13 = vld [vmem:[%s889_s24 + $0x38] sm:$0xff] }
  0x54   : > { %s527_s18 = sshll.u32 %s1029_s12, 8  ;;  %v249_v11 = vcombine.high %v217_v8, %v217_v8  ;;  %v220_v14 = vld [vmem:[%s889_s24 + $0x40] sm:$0xff]  ;;  %v250_v15 = vcombine.high %v218_v12, %v218_v12  ;;  %v251_v16 = vcombine.high %v219_v13, %v219_v13  ;;  %v221_v18 = vld [vmem:[%s889_s24 + $0x48] sm:$0xff]  ;;  %v222_v19 = vld [vmem:[%s889_s24 + $0x50] sm:$0xff] }
  0x55   : > { %s904_s26 = scalar_lea.vmem %s1006_s2, %s527_s18  ;;  %v252_v17 = vcombine.high %v220_v14, %v220_v14  ;;  %v223_v20 = vld [vmem:[%s889_s24 + $0x58] sm:$0xff]  ;;  %v253_v21 = vcombine.high %v221_v18, %v221_v18  ;;  %v254_v22 = vcombine.high %v222_v19, %v222_v19  ;;  %v224_v24 = vld [vmem:[%s889_s24 + $0x60] sm:$0xff]  ;;  %v225_v25 = vld [vmem:[%s889_s24 + $0x68] sm:$0xff] }
  0x56   : > { %276 = vst [vmem:[%s904_s26] sm:$0xf] %v212_v0  ;;  %278 = vst [vmem:[%s904_s26 + $0x10] sm:$0xf] %v213_v1  ;;  %v255_v23 = vcombine.high %v223_v20, %v223_v20  ;;  %v226_v26 = vld [vmem:[%s889_s24 + $0x70] sm:$0xff]  ;;  %v256_v27 = vcombine.high %v224_v24, %v224_v24  ;;  %v257_v28 = vcombine.high %v225_v25, %v225_v25  ;;  %v227_v30 = vld [vmem:[%s889_s24 + $0x78] sm:$0xff] }
  0x57   : > { %280 = vst [vmem:[%s904_s26 + $0x20] sm:$0xf] %v214_v2  ;;  %282 = vst [vmem:[%s904_s26 + $0x30] sm:$0xf] %v215_v6  ;;  %v258_v29 = vcombine.high %v226_v26, %v226_v26  ;;  %v308_v31 = vld [vmem:[#allocation4] sm:$0x77]  ;;  %v259_v33 = vcombine.high %v227_v30, %v227_v30 }
  0x58   : > { %284 = vst [vmem:[%s904_s26 + $0x40] sm:$0xf] %v216_v7  ;;  %286 = vst [vmem:[%s904_s26 + $0x50] sm:$0xf] %v217_v8  ;;  %v309_v32 = vld [vmem:[#allocation4 + $0x8] sm:$0x77]  ;;  %v340_v34 = vcombine.low %v308_v31, %v308_v31 }
  0x59   : > { %277 = vst [vmem:[%s904_s26 + $0x8] sm:$0xf] %v244_v3  ;;  %279 = vst [vmem:[%s904_s26 + $0x18] sm:$0xf] %v245_v4  ;;  %v341_v35 = vcombine.low %v309_v32, %v309_v32  ;;  %v310_v36 = vld [vmem:[#allocation4 + $0x10] sm:$0x77] }
  0x5a   : > { %281 = vst [vmem:[%s904_s26 + $0x28] sm:$0xf] %v246_v5  ;;  %288 = vst [vmem:[%s904_s26 + $0x60] sm:$0xf] %v218_v12  ;;  %v311_v37 = vld [vmem:[#allocation4 + $0x18] sm:$0x77]  ;;  %v342_v39 = vcombine.low %v310_v36, %v310_v36 }
  0x5b   : > { %290 = vst [vmem:[%s904_s26 + $0x70] sm:$0xf] %v219_v13  ;;  %292 = vst [vmem:[%s904_s26 + $0x80] sm:$0xf] %v220_v14  ;;  %v312_v38 = vld [vmem:[#allocation4 + $0x20] sm:$0x77]  ;;  %v343_v40 = vcombine.low %v311_v37, %v311_v37 }
  0x5c   : > { %283 = vst [vmem:[%s904_s26 + $0x38] sm:$0xf] %v247_v9  ;;  %285 = vst [vmem:[%s904_s26 + $0x48] sm:$0xf] %v248_v10  ;;  %v344_v41 = vcombine.low %v312_v38, %v312_v38  ;;  %v313_v42 = vld [vmem:[#allocation4 + $0x28] sm:$0x77] }
  0x5d   : > { %287 = vst [vmem:[%s904_s26 + $0x58] sm:$0xf] %v249_v11  ;;  %294 = vst [vmem:[%s904_s26 + $0x90] sm:$0xf] %v221_v18  ;;  %v314_v43 = vld [vmem:[#allocation4 + $0x30] sm:$0x77]  ;;  %v345_v45 = vcombine.low %v313_v42, %v313_v42 }
  0x5e   : > { %296 = vst [vmem:[%s904_s26 + $0xa0] sm:$0xf] %v222_v19  ;;  %298 = vst [vmem:[%s904_s26 + $0xb0] sm:$0xf] %v223_v20  ;;  %v315_v44 = vld [vmem:[#allocation4 + $0x38] sm:$0x77]  ;;  %v346_v46 = vcombine.low %v314_v43, %v314_v43 }
  0x5f   : > { %289 = vst [vmem:[%s904_s26 + $0x68] sm:$0xf] %v250_v15  ;;  %291 = vst [vmem:[%s904_s26 + $0x78] sm:$0xf] %v251_v16  ;;  %v347_v47 = vcombine.low %v315_v44, %v315_v44  ;;  %v316_v48 = vld [vmem:[#allocation4 + $0x40] sm:$0x77] }
  0x60   : > { %293 = vst [vmem:[%s904_s26 + $0x88] sm:$0xf] %v252_v17  ;;  %300 = vst [vmem:[%s904_s26 + $0xc0] sm:$0xf] %v224_v24  ;;  %v317_v49 = vld [vmem:[#allocation4 + $0x48] sm:$0x77]  ;;  %v348_v51 = vcombine.low %v316_v48, %v316_v48 }
  0x61   : > { %302 = vst [vmem:[%s904_s26 + $0xd0] sm:$0xf] %v225_v25  ;;  %304 = vst [vmem:[%s904_s26 + $0xe0] sm:$0xf] %v226_v26  ;;  %v318_v50 = vld [vmem:[#allocation4 + $0x50] sm:$0x77]  ;;  %v349_v52 = vcombine.low %v317_v49, %v317_v49 }
  0x62   : > { %295 = vst [vmem:[%s904_s26 + $0x98] sm:$0xf] %v253_v21  ;;  %297 = vst [vmem:[%s904_s26 + $0xa8] sm:$0xf] %v254_v22  ;;  %v350_v53 = vcombine.low %v318_v50, %v318_v50  ;;  %v319_v54 = vld [vmem:[#allocation4 + $0x58] sm:$0x77] }
  0x63   : > { %299 = vst [vmem:[%s904_s26 + $0xb8] sm:$0xf] %v255_v23  ;;  %306 = vst [vmem:[%s904_s26 + $0xf0] sm:$0xf] %v227_v30  ;;  %v320_v55 = vld [vmem:[#allocation4 + $0x60] sm:$0x77]  ;;  %v351_v57 = vcombine.low %v319_v54, %v319_v54 }
  0x64   : > { %373 = vst [vmem:[%s904_s26 + $0x8] sm:$0x70] %v308_v31  ;;  %375 = vst [vmem:[%s904_s26 + $0x18] sm:$0x70] %v309_v32  ;;  %v321_v56 = vld [vmem:[#allocation4 + $0x68] sm:$0x77]  ;;  %v352_v58 = vcombine.low %v320_v55, %v320_v55 }
  0x65   : > { %301 = vst [vmem:[%s904_s26 + $0xc8] sm:$0xf] %v256_v27  ;;  %303 = vst [vmem:[%s904_s26 + $0xd8] sm:$0xf] %v257_v28  ;;  %v353_v59 = vcombine.low %v321_v56, %v321_v56  ;;  %v322_v60 = vld [vmem:[#allocation4 + $0x70] sm:$0x77] }
  0x66   : > { %305 = vst [vmem:[%s904_s26 + $0xe8] sm:$0xf] %v258_v29  ;;  %377 = vst [vmem:[%s904_s26 + $0x28] sm:$0x70] %v310_v36  ;;  %v323_v61 = vld [vmem:[#allocation4 + $0x78] sm:$0x77]  ;;  %v354_v62 = vcombine.low %v322_v60, %v322_v60 }
  0x67   : > { %379 = vst [vmem:[%s904_s26 + $0x38] sm:$0x70] %v311_v37  ;;  %381 = vst [vmem:[%s904_s26 + $0x48] sm:$0x70] %v312_v38  ;;  %v355_v63 = vcombine.low %v323_v61, %v323_v61 }
  0x68   : > { %307 = vst [vmem:[%s904_s26 + $0xf8] sm:$0xf] %v259_v33  ;;  %372 = vst [vmem:[%s904_s26] sm:$0x70] %v340_v34 }
  0x69   : > { %374 = vst [vmem:[%s904_s26 + $0x10] sm:$0x70] %v341_v35  ;;  %383 = vst [vmem:[%s904_s26 + $0x58] sm:$0x70] %v313_v42 }
  0x6a   : > { %385 = vst [vmem:[%s904_s26 + $0x68] sm:$0x70] %v314_v43  ;;  %387 = vst [vmem:[%s904_s26 + $0x78] sm:$0x70] %v315_v44 }
  0x6b   : > { %376 = vst [vmem:[%s904_s26 + $0x20] sm:$0x70] %v342_v39  ;;  %378 = vst [vmem:[%s904_s26 + $0x30] sm:$0x70] %v343_v40 }
  0x6c   : > { %380 = vst [vmem:[%s904_s26 + $0x40] sm:$0x70] %v344_v41  ;;  %389 = vst [vmem:[%s904_s26 + $0x88] sm:$0x70] %v316_v48 }
  0x6d   : > { %391 = vst [vmem:[%s904_s26 + $0x98] sm:$0x70] %v317_v49  ;;  %393 = vst [vmem:[%s904_s26 + $0xa8] sm:$0x70] %v318_v50 }
  0x6e   : > { %382 = vst [vmem:[%s904_s26 + $0x50] sm:$0x70] %v345_v45  ;;  %384 = vst [vmem:[%s904_s26 + $0x60] sm:$0x70] %v346_v46 }
  0x6f   : > { %386 = vst [vmem:[%s904_s26 + $0x70] sm:$0x70] %v347_v47  ;;  %395 = vst [vmem:[%s904_s26 + $0xb8] sm:$0x70] %v319_v54 }
  0x70   : > { %397 = vst [vmem:[%s904_s26 + $0xc8] sm:$0x70] %v320_v55  ;;  %399 = vst [vmem:[%s904_s26 + $0xd8] sm:$0x70] %v321_v56 }
  0x71   : > { %388 = vst [vmem:[%s904_s26 + $0x80] sm:$0x70] %v348_v51  ;;  %390 = vst [vmem:[%s904_s26 + $0x90] sm:$0x70] %v349_v52 }
  0x72   : > { %392 = vst [vmem:[%s904_s26 + $0xa0] sm:$0x70] %v350_v53  ;;  %401 = vst [vmem:[%s904_s26 + $0xe8] sm:$0x70] %v322_v60 }
  0x73   : > { %403 = vst [vmem:[%s904_s26 + $0xf8] sm:$0x70] %v323_v61  ;;  %394 = vst [vmem:[%s904_s26 + $0xb0] sm:$0x70] %v351_v57 }
  0x74   : > { %396 = vst [vmem:[%s904_s26 + $0xc0] sm:$0x70] %v352_v58  ;;  %398 = vst [vmem:[%s904_s26 + $0xd0] sm:$0x70] %v353_v59 }
  0x75   : > { %400 = vst [vmem:[%s904_s26 + $0xe0] sm:$0x70] %v354_v62  ;;  %402 = vst [vmem:[%s904_s26 + $0xf0] sm:$0x70] %v355_v63 }
  0x76 PF: > { %s16_s14 = sadd.s32 1, %s738_s14   ;;  %s1021_s9 = smov %s722_s10 }
  0x77   : > { %p13_p9 = scmp.ge.s32.totalorder %s16_s14, 4   ;;  %s1022_s10 = smov %s726_s11 }
  0x78   : > { %s1023_s11 = smov %s848_s15  ;;  %s1024_s12 = smov %s734_s13 }
  0x79   : > { %s1025_s13 = smov %s1027_s22  ;;  %15 = sbr.rel (!%p13_p9) target bundleno = 5 (0x5), region = 73 }
  0x80   :  { %434 = vsyncpa [#allocation3], 1 }
  0x81   :  { %436 = vsyncpa [#allocation3 + $0x1], 1 }
  0x82   :  { %437 = vsyncpa [#allocation5], 1 }

</bundles_post_ra>
